<compile_context>
chip_gen: v7x
topology: tpu7x:2x2x1
jax: 0.10.0
libtpu: 0.0.40
codegen_flags: <defaults>
</compile_context>

<pallas_src>
import jax
import jax.numpy as jnp
from jax.experimental import pallas as pl
from jax.experimental.pallas import tpu as pltpu

_SUBLANE = 8
_LANE = 128
_TARGET_BLOCK_BYTES = 8 << 20   # ~8 MiB/block; 2x(in)+2x(out) buffers ~= 32 MiB
_MIN_GRID_STEPS = 4             # keep >= 4 grid steps so both v7x TCs get work
_VMEM_LIMIT_BYTES = 48 << 20    # > v5e's 16 MiB default scoped VMEM, < v7x 64 MiB


def _elemwise_kernel(x_ref, o_ref):
    # out = 2*x + 5 - 3/(1+x)  ==  2*d + 3 - 3/d,  with d = 1 + x.
    # The divide is a precise reciprocal (EUP estimate + VALU refinement); the
    # remaining mul/add keep the kernel HBM-bound on v5e/v6e/v7x.
    # NOTE: x == -1 is a singularity, matching the PyTorch reference.
    # Masked edge blocks may read OOB garbage into the reciprocal (possible
    # inf/NaN) -- harmless: those lanes are never written back and there is no
    # reduction over the block.
    d = 1.0 + x_ref[...]
    o_ref[...] = 2.0 * d + 3.0 - 3.0 * pl.reciprocal(d, approx=False)


def _round_up(v, m):
    return ((v + m - 1) // m) * m


def _pick_col_tile(w):
    """Full width unless W is a huge lane-aligned multiple we can split."""
    if w % _LANE != 0 or w <= 4096:
        return w            # block spans the full last dim (always legal)
    c = 4096
    while c >= _LANE:
        if w % c == 0:
            return c
        c -= _LANE
    return w


def _pick_row_tile(rows, tc, itemsize):
    if rows <= _SUBLANE:
        return rows         # block equals the full sublane dim -> legal
    # Largest multiple-of-8 row count that keeps one block under the target.
    tr_bytes = max(_SUBLANE,
                   (_TARGET_BLOCK_BYTES // max(1, tc * itemsize))
                   // _SUBLANE * _SUBLANE)
    # Cap so the grid has >= _MIN_GRID_STEPS steps (v7x megacore sharding).
    tr_split = max(_SUBLANE, _round_up(pl.cdiv(rows, _MIN_GRID_STEPS), _SUBLANE))
    return max(_SUBLANE, min(tr_bytes, tr_split, _round_up(rows, _SUBLANE)))


def _run_2d(x2d):
    rows, cols = x2d.shape
    tc = _pick_col_tile(cols)
    tr = _pick_row_tile(rows, tc, x2d.dtype.itemsize)
    grid = (pl.cdiv(rows, tr), cols // tc)
    return pl.pallas_call(
        _elemwise_kernel,
        out_shape=jax.ShapeDtypeStruct((rows, cols), x2d.dtype),
        grid_spec=pltpu.PrefetchScalarGridSpec(
            num_scalar_prefetch=0,
            grid=grid,
            in_specs=[pl.BlockSpec((tr, tc), lambda i, j: (i, j))],
            out_specs=pl.BlockSpec((tr, tc), lambda i, j: (i, j)),
        ),
        compiler_params=pltpu.CompilerParams(
            dimension_semantics=("parallel", "parallel"),
            vmem_limit_bytes=_VMEM_LIMIT_BYTES,
        ),
    )(x2d)


def _run_3d(x3d):
    # Sublane-hostile trailing dims (H % 8 != 0 with more than one leading
    # slab): blocks span the whole (H, W) slab; only the (layout-free) leading
    # axis is tiled, so no relayout copy is ever forced.
    l, h, w = x3d.shape
    slab_bytes = h * w * x3d.dtype.itemsize
    lb = max(1, min(l, _TARGET_BLOCK_BYTES // max(1, slab_bytes)))
    lb = min(lb, max(1, pl.cdiv(l, _MIN_GRID_STEPS)))
    grid = (pl.cdiv(l, lb),)
    return pl.pallas_call(
        _elemwise_kernel,
        out_shape=jax.ShapeDtypeStruct((l, h, w), x3d.dtype),
        grid_spec=pltpu.PrefetchScalarGridSpec(
            num_scalar_prefetch=0,
            grid=grid,
            in_specs=[pl.BlockSpec((lb, h, w), lambda i: (i, 0, 0))],
            out_specs=pl.BlockSpec((lb, h, w), lambda i: (i, 0, 0)),
        ),
        compiler_params=pltpu.CompilerParams(
            dimension_semantics=("parallel",),
            vmem_limit_bytes=_VMEM_LIMIT_BYTES,
        ),
    )(x3d)


def pt_module_forward(x):
    """out = 2*x + 5 - 3/(1+x), elementwise; same shape/dtype as x."""
    shape = x.shape
    if x.ndim < 2:
        # The PyTorch module indexes [i, j]; 0/1-D handled with plain fused XLA.
        d = 1.0 + x
        return 2.0 * d + 3.0 - 3.0 / d
    if x.ndim == 2:
        return _run_2d(x)

    h, w = shape[-2], shape[-1]
    lead = 1
    for s in shape[:-2]:
        lead *= s

    if h % _SUBLANE == 0 or lead == 1:
        # Collapsing everything above the last dim preserves the (8,128)-tiled
        # HBM layout (each (H, W) slab has no sublane padding), so the reshape
        # lowers to a bitcast rather than a copy.
        out = _run_2d(x.reshape(lead * h, w))
    else:
        # Collapse only the axes above the trailing slab (always layout-free).
        out = _run_3d(x.reshape(lead, h, w))
    return out.reshape(shape)


def _reference(x):
    return x * 2.0 + 5.0 - 3.0 / (1.0 + x)


if __name__ == "__main__":
    key = jax.random.PRNGKey(0)
    # Values > 0 so (1 + x) never hits the x == -1 singularity.
    x = jax.random.uniform(key, (2, 4, 16, 16), dtype=jnp.float32,
                           minval=0.0, maxval=2.0)

    out = jax.block_until_ready(pt_module_forward(x))
    assert out.shape == x.shape and out.dtype == x.dtype
    assert jnp.allclose(out, _reference(x), atol=1e-5, rtol=1e-5)

    # Also exercise the sublane-hostile (3-D slab) path once.
    x2 = jax.random.uniform(jax.random.PRNGKey(1), (2, 3, 5, 7),
                            dtype=jnp.float32, minval=0.0, maxval=2.0)
    out2 = jax.block_until_ready(pt_module_forward(x2))
    assert jnp.allclose(out2, _reference(x2), atol=1e-5, rtol=1e-5)

    print("KERNEL_OK")
</pallas_src>

<mosaic_0001>
module attributes {stable_mosaic.version = 11 : i64} {
  func.func @_elemwise_kernel(%arg0: i32, %arg1: i32, %arg2: memref<32x16xf32, #tpu.memory_space<vmem>>, %arg3: memref<32x16xf32, #tpu.memory_space<vmem>>) attributes {dimension_semantics = [#tpu.dimension_semantics<parallel>, #tpu.dimension_semantics<parallel>], iteration_bounds = array<i64: 4, 1>, scalar_prefetch = 0 : i64, scratch_operands = 0 : i64, tpu.core_type = #tpu.core_type<tc>, window_params = [{transform_indices = @transform_0, window_bounds = array<i64: 32, 16>}, {transform_indices = @transform_1, window_bounds = array<i64: 32, 16>}]} {
    %c0 = arith.constant 0 : index
    %c0_0 = arith.constant 0 : index
    %0 = vector.load %arg2[%c0, %c0_0] : memref<32x16xf32, #tpu.memory_space<vmem>>, vector<32x16xf32>
    %cst = arith.constant 1.000000e+00 : f32
    %1 = vector.broadcast %cst : f32 to vector<32x16xf32>
    %2 = arith.addf %1, %0 : vector<32x16xf32>
    %cst_1 = arith.constant 2.000000e+00 : f32
    %3 = vector.broadcast %cst_1 : f32 to vector<32x16xf32>
    %4 = arith.mulf %3, %2 : vector<32x16xf32>
    %cst_2 = arith.constant 3.000000e+00 : f32
    %5 = vector.broadcast %cst_2 : f32 to vector<32x16xf32>
    %6 = arith.addf %4, %5 : vector<32x16xf32>
    %7 = tpu.reciprocal %2 : vector<32x16xf32> -> vector<32x16xf32>
    %cst_3 = arith.constant 3.000000e+00 : f32
    %8 = vector.broadcast %cst_3 : f32 to vector<32x16xf32>
    %9 = arith.mulf %8, %7 : vector<32x16xf32>
    %10 = arith.subf %6, %9 : vector<32x16xf32>
    %c0_4 = arith.constant 0 : index
    %c0_5 = arith.constant 0 : index
    %11 = vector.load %arg3[%c0_4, %c0_5] : memref<32x16xf32, #tpu.memory_space<vmem>>, vector<32x16xf32>
    tpu.vector_store %arg3[%c0_4, %c0_5], %10 {strides = array<i32>} : memref<32x16xf32, #tpu.memory_space<vmem>>, vector<32x16xf32>,
    return
  }
  func.func @transform_0(%arg0: i32, %arg1: i32) -> (i32, i32) {
    %c0_i32 = arith.constant 0 : i32
    return %arg0, %arg1 : i32, i32
  }
  func.func @transform_1(%arg0: i32, %arg1: i32) -> (i32, i32) {
    %c0_i32 = arith.constant 0 : i32
    return %arg0, %arg1 : i32, i32
  }
}

</mosaic_0001>

<bundles_post_ra>
// kernel: tpu_custom_call.1
= control target key start
LH: loop header
LB: loop body
LE: loop exit
PB: predicated region body
PF: predicated region fallthrough
CT: control target
= control target key end

     0   :  { %s339_s6 = smov 0   ;;  %s341_s7 = smov 0   ;;  %s372_s0 = inlined_call_operand.vmem [shape: f32[128,16], index: 0, kind: input, shape index: {}]   ;;  %s373_s1 = inlined_call_operand.vmem [shape: f32[128,16], index: 1, kind: output, shape index: {}]  }
   0x1   :  { %s343_s8 = smov 0  }
   0x2 LB: > { %s23_s9 = sadd.s32 1, %s323_s7  ;;  %p266_p0 = scmp.ge.s32.totalorder %s327_s8, 1  ;;  %s327_s8 = sphi %s343_s8, %s11_s8   ;;  %s323_s7 = sphi %s341_s7, %s375_s7   ;;  %s319_s6 = sphi %s339_s6, %s374_s6  }
   0x3   : > { %p25_p1 = scmp.ge.s32.totalorder %s23_s9, 4  ;;  %p107_p2 = scmp.lt.s32.totalorder %s327_s8, 5 }
   0x5   : > { %s377_s9 = smov (%p25_p1, %s23_s9), 0  ;;  %p108_p3 = pnand %p266_p0, %p107_p2 }
   0x6   : > { %s267_s10 = sshll.u32 (!%p108_p3), %s319_s6, 2  ;;  %vm179_vm0 = vcmask (!%p108_p3), 130048  }
   0x7   : > { %111 = sbr.rel (%p108_p3) target bundleno = 39 (0x27), region = 24  ;;  %p134_p4 = scmp.lt.s32.totalorder (!%p108_p3), %s267_s10, 15 }
   0xe   : > { %s379_s10 = smov (!%p134_p4, %s267_s10), 15 }
   0xf   : > { %s268_s11 = sshll.u32 %s379_s10, 3 }
  0x10   : > { %s140_s14 = scalar_lea.vmem %s372_s0, %s268_s11  ;;  %s149_s17 = scalar_lea.vmem %s373_s1, %s268_s11 }
  0x11   : > { %v151_v0 = vld [vmem:[%s140_s14] sm:$0xff]  ;;  %v152_v1 = vld [vmem:[%s140_s14 + $0x8] sm:$0xff]  ;;  %v153_v2 = vld [vmem:[%s140_s14 + $0x10] sm:$0xff] }
  0x12   : > { %v155_v3 = vadd.f32 1.0, %v151_v0  ;;  %v156_v4 = vadd.f32 1.0, %v152_v1  ;;  %v157_v5 = vadd.f32 1.0, %v153_v2  ;;  %v154_v6 = vld [vmem:[%s140_s14 + $0x18] sm:$0xff] }
  0x13   : > { %v158_v7 = vadd.f32 1.0, %v154_v6 }
  0x14   : > { %297 = vrcp.f32 %v155_v3  ;;  %v159_v8 = vmul.f32 2.0, %v155_v3  ;;  %v160_v9 = vmul.f32 2.0, %v156_v4  ;;  %v161_v10 = vmul.f32 2.0, %v157_v5 }
  0x15   : > { %299 = vrcp.f32 %v156_v4  ;;  %v162_v11 = vmul.f32 2.0, %v158_v7 }
  0x16   : > { %301 = vrcp.f32 %v157_v5  ;;  %v163_v12 = vadd.f32 3.0, %v159_v8  ;;  %v164_v14 = vadd.f32 3.0, %v160_v9  ;;  %v165_v17 = vadd.f32 3.0, %v161_v10 }
  0x17   : > { %303 = vrcp.f32 %v158_v7  ;;  %v166_v20 = vadd.f32 3.0, %v162_v11 }
  0x1e   : > { %v298_v13 = vpop.eup %297 }
  0x1f   : > { %v300_v15 = vpop.eup %299  ;;  %v171_v16 = vmul.f32 3.0, %v298_v13 }
  0x20   : > { %v302_v18 = vpop.eup %301  ;;  %v172_v19 = vmul.f32 3.0, %v300_v15 }
  0x21   : > { %v304_v21 = vpop.eup %303  ;;  %v175_v22 = vsub.f32 %v163_v12, %v171_v16  ;;  %v173_v23 = vmul.f32 3.0, %v302_v18 }
  0x22   : > { %v176_v24 = vsub.f32 %v164_v14, %v172_v19  ;;  %v174_v25 = vmul.f32 3.0, %v304_v21 }
  0x23   : > { %180 = vst.msk [vmem:[%s149_s17] sm:$0xff] %vm179_vm0, %v175_v22  ;;  %v177_v26 = vsub.f32 %v165_v17, %v173_v23 }
  0x24   : > { %181 = vst.msk [vmem:[%s149_s17 + $0x8] sm:$0xff] %vm179_vm0, %v176_v24  ;;  %v178_v27 = vsub.f32 %v166_v20, %v174_v25 }
  0x25   : > { %182 = vst.msk [vmem:[%s149_s17 + $0x10] sm:$0xff] %vm179_vm0, %v177_v26 }
  0x26   : > { %183 = vst.msk [vmem:[%s149_s17 + $0x18] sm:$0xff] %vm179_vm0, %v178_v27 }
  0x27 PF: > { %s11_s8 = sadd.s32 1, %s327_s8   ;;  %s374_s6 = smov %s323_s7 }
  0x28   : > { %p8_p5 = scmp.ge.s32.totalorder %s11_s8, 6   ;;  %s375_s7 = smov %s377_s9 }
  0x2a   :  { %10 = sbr.rel (!%p8_p5) target bundleno = 2 (0x2), region = 54 }

</bundles_post_ra>
